<compile_context>
chip_gen: v6e
topology: v6e:2x2x1
jax: 0.10.0
libtpu: 0.0.40
codegen_flags: <defaults>
</compile_context>

<pallas_src>
import functools

import jax
import jax.numpy as jnp
from jax.experimental import pallas as pl
from jax.experimental.pallas import tpu as pltpu


def _round_up(x, m):
    return ((x + m - 1) // m) * m


def _patch_embed_kernel(x_ref, w_ref, b_ref, o_ref):
    # x_ref: (TM, K)   activation tile (flattened patches), compute dtype
    # w_ref: (K, Ep)   projection weight (resident across the grid)
    # b_ref: (1, Ep)   bias (f32, resident)
    # o_ref: (TM, Ep)  output tile
    acc = jnp.dot(x_ref[...], w_ref[...], preferred_element_type=jnp.float32)
    o_ref[...] = (acc + b_ref[...]).astype(o_ref.dtype)


def patch_embedding(x, weight, bias, patch_size, *,
                    compute_dtype=jnp.bfloat16, out_dtype=jnp.float32,
                    tile_m=512):
    """
    x:      [B, C, H, W]   (NCHW)
    weight: [E, C, P, P]   (PyTorch Conv2d layout)
    bias:   [E]
    returns [B, num_patches, E]  (== proj(x).flatten(2).transpose(1, 2))
    """
    B, C, H, W = x.shape
    E = weight.shape[0]
    P = patch_size
    Hp, Wp = H // P, W // P
    N = Hp * Wp
    K = C * P * P
    M = B * N

    # --- im2col (XLA-side), in the narrow compute dtype so the materialized
    # transpose moves half the bytes. ---
    xc = x.astype(compute_dtype)
    patches = (xc.reshape(B, C, Hp, P, Wp, P)
                 .transpose(0, 2, 4, 1, 3, 5)
                 .reshape(M, K))

    # Weight flattened to [K, E] so the kernel computes patches @ w.
    w_flat = weight.reshape(E, K).T.astype(compute_dtype)       # (K, E)
    b_flat = bias.astype(jnp.float32).reshape(1, E)

    # Pad only the embedding axis, and only when it is not lane-aligned.
    # K (the contraction axis) is never padded: full-K blocks are legal, so
    # both operands see the exact same K and no activation copy is needed.
    Ep = _round_up(E, 128) if (E % 128) else E
    if Ep != E:
        w_flat = jnp.pad(w_flat, ((0, 0), (0, Ep - E)))
        b_flat = jnp.pad(b_flat, ((0, 0), (0, Ep - E)))

    # Tile only the fused M = B * num_patches axis.  No M padding (Pallas
    # handles the ragged last block); guarantee >= 2 grid steps when possible
    # so both TensorCores get work under dimension_semantics=("parallel",).
    if M >= 16:
        TM = max(8, min(tile_m, _round_up(pl.cdiv(M, 2), 8)))
    else:
        TM = M
    grid = (pl.cdiv(M, TM),)

    in_b = jnp.dtype(compute_dtype).itemsize
    out_b = jnp.dtype(out_dtype).itemsize

    # VMEM budget: double-buffered streamed act/out + resident weight/bias
    # (note: resident operands are still double-buffered by the default
    # pipeliner; pl.Buffered(1) would shave that but is left out for safety).
    working_set = (2 * TM * K * in_b + 2 * TM * Ep * out_b
                   + 2 * K * Ep * in_b + 2 * Ep * 4)
    try:
        phys_vmem = pltpu.get_tpu_info().vmem_capacity_bytes
    except Exception:
        phys_vmem = 128 * 1024 * 1024
    vmem_limit = int(min(max(2 * working_set, 32 * 1024 * 1024),
                         (phys_vmem * 3) // 4))

    cost = pl.CostEstimate(
        flops=2 * M * K * Ep,
        transcendentals=0,
        bytes_accessed=M * K * in_b + K * Ep * in_b + M * Ep * out_b,
    )

    out = pl.pallas_call(
        _patch_embed_kernel,
        out_shape=jax.ShapeDtypeStruct((M, Ep), out_dtype),
        grid_spec=pltpu.PrefetchScalarGridSpec(
            num_scalar_prefetch=0,
            grid=grid,
            in_specs=[
                pl.BlockSpec((TM, K), lambda i: (i, 0)),    # streamed acts
                pl.BlockSpec((K, Ep), lambda i: (0, 0)),    # resident weight
                pl.BlockSpec((1, Ep), lambda i: (0, 0)),    # resident bias
            ],
            out_specs=pl.BlockSpec((TM, Ep), lambda i: (i, 0)),
        ),
        compiler_params=pltpu.CompilerParams(
            dimension_semantics=("parallel",),
            vmem_limit_bytes=vmem_limit,
        ),
        cost_estimate=cost,
    )(patches, w_flat, b_flat)

    if Ep != E:
        out = out[:, :E]              # only when E is not already lane-aligned
    return out.reshape(B, N, E)


if __name__ == "__main__":
    # Small shapes consistent with the module: img_size=16, patch_size=4,
    # in_channels=3, embed_dim=32.
    B, C, H, W = 2, 3, 16, 16
    P = 4
    E = 32

    key = jax.random.PRNGKey(0)
    kx, kw, kb = jax.random.split(key, 3)
    x = jax.random.normal(kx, (B, C, H, W), dtype=jnp.float32)
    weight = jax.random.normal(kw, (E, C, P, P), dtype=jnp.float32) * 0.02
    bias = jax.random.normal(kb, (E,), dtype=jnp.float32) * 0.02

    fn = jax.jit(functools.partial(patch_embedding, patch_size=P))
    out = jax.block_until_ready(fn(x, weight, bias))

    # Reference in plain JAX (same math as PyTorch Conv2d with stride=kernel).
    Hp, Wp = H // P, W // P
    patches_ref = (x.reshape(B, C, Hp, P, Wp, P)
                     .transpose(0, 2, 4, 1, 3, 5)
                     .reshape(B, Hp * Wp, C * P * P))
    ref = patches_ref @ weight.reshape(E, -1).T + bias[None, None, :]

    assert out.shape == (B, (H // P) * (W // P), E)
    assert out.dtype == jnp.float32
    # bf16 MXU inputs with f32 accumulation -> bf16-level tolerance.
    assert jnp.allclose(out, ref, atol=1e-2, rtol=1e-2)

    print("KERNEL_OK")
</pallas_src>

<mosaic_0001>
module attributes {stable_mosaic.version = 11 : i64} {
  func.func @_patch_embed_kernel(%arg0: i32, %arg1: memref<16x48xbf16, #tpu.memory_space<vmem>>, %arg2: memref<48x128xbf16, #tpu.memory_space<vmem>>, %arg3: memref<1x128xf32, #tpu.memory_space<vmem>>, %arg4: memref<16x128xf32, #tpu.memory_space<vmem>>) attributes {dimension_semantics = [#tpu.dimension_semantics<parallel>], iteration_bounds = array<i64: 2>, scalar_prefetch = 0 : i64, scratch_operands = 0 : i64, tpu.core_type = #tpu.core_type<tc>, window_params = [{transform_indices = @transform_0, window_bounds = array<i64: 16, 48>}, {pipeline_mode = #tpu.pipeline_mode<synchronous>, transform_indices = @transform_1, window_bounds = array<i64: 48, 128>}, {pipeline_mode = #tpu.pipeline_mode<synchronous>, transform_indices = @transform_2, window_bounds = array<i64: 1, 128>}, {transform_indices = @transform_3, window_bounds = array<i64: 16, 128>}]} {
    %c0 = arith.constant 0 : index
    %c0_0 = arith.constant 0 : index
    %0 = vector.load %arg1[%c0, %c0_0] : memref<16x48xbf16, #tpu.memory_space<vmem>>, vector<16x48xbf16>
    %c0_1 = arith.constant 0 : index
    %c0_2 = arith.constant 0 : index
    %1 = vector.load %arg2[%c0_1, %c0_2] : memref<48x128xbf16, #tpu.memory_space<vmem>>, vector<48x128xbf16>
    %cst = arith.constant dense<0.000000e+00> : vector<16x128xf32>
    %2 = tpu.matmul %0, %1, %cst {dimension_numbers = #tpu.dot_dimension_numbers<[1], [0], [0], [1], [0, 0, 1, 1], [], []>} : vector<16x48xbf16>, vector<48x128xbf16>, vector<16x128xf32> -> vector<16x128xf32>
    %c0_3 = arith.constant 0 : index
    %c0_4 = arith.constant 0 : index
    %3 = vector.load %arg3[%c0_3, %c0_4] : memref<1x128xf32, #tpu.memory_space<vmem>>, vector<1x128xf32>
    %4 = vector.broadcast %3 : vector<1x128xf32> to vector<16x128xf32>
    %5 = arith.addf %2, %4 : vector<16x128xf32>
    %c0_5 = arith.constant 0 : index
    %c0_6 = arith.constant 0 : index
    %6 = vector.load %arg4[%c0_5, %c0_6] : memref<16x128xf32, #tpu.memory_space<vmem>>, vector<16x128xf32>
    tpu.vector_store %arg4[%c0_5, %c0_6], %5 {strides = array<i32>} : memref<16x128xf32, #tpu.memory_space<vmem>>, vector<16x128xf32>,
    return
  }
  func.func @transform_0(%arg0: i32) -> (i32, i32) {
    %c0_i32 = arith.constant 0 : i32
    %c0_i32_0 = arith.constant 0 : i32
    return %arg0, %c0_i32 : i32, i32
  }
  func.func @transform_1(%arg0: i32) -> (i32, i32) {
    %c0_i32 = arith.constant 0 : i32
    %c0_i32_0 = arith.constant 0 : i32
    %c0_i32_1 = arith.constant 0 : i32
    return %c0_i32, %c0_i32_0 : i32, i32
  }
  func.func @transform_2(%arg0: i32) -> (i32, i32) {
    %c0_i32 = arith.constant 0 : i32
    %c0_i32_0 = arith.constant 0 : i32
    %c0_i32_1 = arith.constant 0 : i32
    return %c0_i32, %c0_i32_0 : i32, i32
  }
  func.func @transform_3(%arg0: i32) -> (i32, i32) {
    %c0_i32 = arith.constant 0 : i32
    %c0_i32_0 = arith.constant 0 : i32
    return %arg0, %c0_i32 : i32, i32
  }
}

</mosaic_0001>

<bundles_post_ra>
// kernel: patch_embedding.1
= control target key start
LH: loop header
LB: loop body
LE: loop exit
PB: predicated region body
PF: predicated region fallthrough
CT: control target
= control target key end

     0   :  { %8 = vsyncpa [#allocation3], 0  ;;  %s614_s0 = inlined_call_operand.vmem [shape: bf16[32,48], index: 0, kind: input, shape index: {}]   ;;  %s615_s1 = inlined_call_operand.vmem [shape: bf16[48,128], index: 1, kind: input, shape index: {}]   ;;  %s616_s2 = inlined_call_operand.vmem [shape: f32[1,128], index: 2, kind: input, shape index: {}]   ;;  %s617_s3 = inlined_call_operand.hbm [shape: f32[32,128], index: 3, kind: output, shape index: {}]  }
   0x1   :  { %10 = vsyncpa [#allocation3 + $0x1], 0  ;;  %s501_s12 = smov 0   ;;  %s503_s13 = smov 0  }
   0x2   :  { %s505_s14 = smov 0   ;;  %s507_s15 = smov 0  }
   0x3 LB: > { %s522_s16 = sadd.s32 4294967295, %s474_s15   ;;  %s334_s17 = sadd.s32 4294967294, %s474_s15   ;;  %s474_s15 = sphi %s507_s15, %s623_s15   ;;  %s470_s14 = sphi %s505_s14, %s622_s14   ;;  %s466_s13 = sphi %s503_s13, %s621_s13   ;;  %s462_s12 = sphi %s501_s12, %s620_s12  }
   0x4   : > { %s526_s18 = sadd.s32 1, %s474_s15   ;;  %s91_s19 = sadd.s32 1, %s470_s14 }
   0x5   : > { %s88_s20 = ssub.s32 %s474_s15, %s526_s18  ;;  %p101_p0 = scmp.ne.s32.totalorder %s470_s14, %s466_s13 }
   0x6   : > { %p89_p1 = scmp.eq.s32.totalorder %s88_s20, 0  ;;  %p102_p2 = scmp.eq.s32.totalorder %s522_s16, 1 }
   0x7   : > { %p107_p3 = scmp.ne.s32.totalorder %s466_s13, %s462_s12  ;;  %p108_p4 = scmp.eq.s32.totalorder %s334_s17, 1 }
   0x8   : > { %s537_s21 = scalar_select %p89_p1, %s470_s14, %s91_s19  }
   0x9   : > { %p539_p5 = por %p102_p2, %p101_p0  ;;  %p543_p6 = por %p108_p4, %p107_p3 }
   0xa   : > { %p337_p7 = scmp.ge.s32.totalorder %s474_s15, 1  ;;  %p141_p8 = scmp.lt.s32.totalorder %s474_s15, 3 }
   0xc   : > { %p142_p9 = pnand %p337_p7, %p141_p8 }
   0xd   : > { %s339_s28 = sshll.u32 (!%p142_p9), %s522_s16, 1  ;;  %s162_s8 = sand.u32 (!%p142_p9), 1, %s466_s13  }
   0xe   : > { %145 = sbr.rel (%p142_p9) target bundleno = 245 (0xf5), region = 32  ;;  %p166_p10 = scmp.lt.s32.totalorder (!%p142_p9), %s339_s28, 3 }
   0xf   : > { %s338_s9 = sshll.u32 (!%p142_p9), %s162_s8, 4  ;;  %s352_s20 = sshll.u32 (!%p142_p9), %s522_s16, 8 }
  0x10   : > { %s164_s17 = scalar_lea.vmem (!%p142_p9), [#allocation2], %s338_s9  ;;  %s572_s26 = scalar_lea.hbm (!%p142_p9), %s617_s3, %s352_s20 }
  0x11   : > { %s272_s19 = sshll.u32 (!%p142_p9), %s164_s17, 4  ;;  %s574_s27 = scalar_lea.sflag (!%p142_p9), [#allocation3], %s162_s8  ;;  %s567_s19 = int_to_ptr.vmem [resolvable:$true] %s272_s19 }
  0x12   : > { %s478_s16 = smov (!%p142_p9), [#allocation2]  }
  0x13   : > { %v410_v0 = vld [vmem:[%s615_s1 + $0x10] sm:$0xff]   ;;  %v476_v1 = vmov 0.0   ;;  %v411_v2 = vld [vmem:[%s615_s1 + $0x8] sm:$0xff]   ;;  %vm477_vm0 = vmmov 0   ;;  %s625_s28 = smov (!%p166_p10, %s339_s28), 3  ;;  %v412_v3 = vld [vmem:[%s615_s1] sm:$0xff]  }
  0x14   : > { %357 = vmatprep.subr.bf16.mxu0 %v476_v1  ;;  %363 = vmatprep.mubr.msk.bf16.mxu0 %vm477_vm0, %v476_v1  ;;  %s340_s4 = sshll.u32 %s625_s28, 2  ;;  %vm211_vm1 = vcmask 392192   ;;  %v341_v5 = vld [vmem:[%s616_s2] ss:$0 sm:$0xff]  ;;  %s414_s28 = scalar_lea.vmem %s567_s19, 256 }
  0x15   : > { %358 = vmatpush3.bf16.msra.mxu0 %v410_v0  ;;  %s169_s7 = scalar_lea.vmem %s614_s0, %s340_s4  ;;  %p415_p11 = scmp.ne.s32.totalorder %s567_s19, %s414_s28 }
  0x16   : > { %359 = vmatprep.subr.bf16.mxu0 %v476_v1  ;;  %v413_v4 = vld [vmem:[%s169_s7] sm:$0xff]   ;;  %s418_s29 = sshll.u32 %s478_s16, 4  ;;  %s419_s29 = int_to_ptr.vmem [resolvable:$false] %s418_s29 }
  0x17   : > { %p416_p12 = pnand %p415_p11, %p539_p5  ;;  %s420_s30 = scalar_lea.vmem %s419_s29, 512 }
  0x18   : > { %p421_p0 = scmp.lt.s32.totalorder %s567_s19, %s419_s29  ;;  %p422_p1 = scmp.lt.s32.totalorder %s420_s30, %s414_s28 }
  0x19   : > { %360 = vmatpush3.bf16.msra.mxu0 %v411_v2  ;;  %p417_p13 = pneg %p416_p12 }
  0x1a   : > { %361 = vmatprep.subr.bf16.mxu0 %v476_v1  ;;  %p423_p2 = por %p422_p1, %p421_p0 }
  0x1c   : > { %p424_p3 = pnand %p423_p2, %p417_p13 }
  0x1d   : > { %362 = vmatpush3.bf16.msra.mxu0 %v412_v3 }
  0x20   : > { %364 = vmatmul.mubr.msk.bf16.vlgmr.msra.gmra.mxu0 %vm211_vm1, %v413_v4 }
  0xe0   : > { %v249_v6 = vpop.f32.mrf.mxu0 }
  0xe1   : > { %v250_v7 = vadd.f32 %v341_v5, %v249_v6 }
  0xe2   : > { %v365_v8 = vpop.f32.mrf.mxu0 }
  0xe3   : > { %256 = vst [vmem:[%s164_s17] sm:$0xff] %v250_v7 }
  0xe4   : > { %v252_v9 = vpop.f32.mrf.mxu0 }
  0xe5   : > { %v253_v10 = vadd.f32 %v341_v5, %v252_v9 }
  0xe6   : > { %v366_v11 = vpop.f32.mrf.mxu0 }
  0xe7   : > { %257 = vst [vmem:[%s164_s17 + $0x8] sm:$0xff] %v253_v10 }
  0xe8   : > { %427 = shalt.err (!%p424_p3)
}
  0xe9   : > { %s428_s4 = scalar_lea.hbm %s572_s26, 256  ;;  %s432_s7 = scalar_lea.hbm %s617_s3, 512 }
  0xea   : > { %p429_p4 = scmp.ne.s32.totalorder %s572_s26, %s428_s4  ;;  %p433_p9 = scmp.lt.s32.totalorder %s572_s26, %s617_s3 }
  0xeb   : > { %p434_p10 = scmp.lt.s32.totalorder %s432_s7, %s428_s4 }
  0xec   : > { %p430_p7 = pnand %p429_p4, %p539_p5 }
  0xed   : > { %p435_p11 = por %p434_p10, %p433_p9 }
  0xee   : > { %p431_p8 = pneg %p430_p7 }
  0xf0   : > { %p436_p12 = pnand %p435_p11, %p431_p8 }
  0xf2   : > { %439 = shalt.err (!%p436_p12)
}
  0xf3   : > { %s479_s10 = smov 128   ;;  %s480_s11 = smov 8  }
  0xf4   : > { %367 = dma.vmem_to_hbm [thread:$0]  (%p539_p5), %s567_s19, 256, %s572_s26, %s574_s27, %s479_s10, %s479_s10, %s480_s11  }
  0xf5 PF: > { %p373_p13 = scmp.ge.s32.totalorder %s474_s15, 2  ;;  %s287_s17 = sand.u32 1, %s462_s12  }
  0xf6   : > { %s288_s20 = scalar_lea.sflag [#allocation3], %s287_s17 }
  0xf7   : > { %p370_p0 = pnand %p373_p13, %p543_p6 }
  0xf9   : > { %p371_p1 = pneg %p370_p0 }
  0xfb   : > { %457 = dma.done.wait (%p371_p1), %s288_s20, 256  }
  0xfc   : > { %459 = vsyncadd (%p371_p1), %s288_s20, 4294967040  ;;  %p13_p2 = scmp.ge.s32.totalorder %s526_s18, 4   ;;  %s620_s12 = smov %s466_s13 }
  0xfd   : > { %s621_s13 = smov %s470_s14  ;;  %s622_s14 = smov %s537_s21 }
  0xfe   : > { %s623_s15 = smov %s526_s18  ;;  %15 = sbr.rel (!%p13_p2) target bundleno = 3 (0x3), region = 67 }
 0x103   :  { %293 = vsyncpa [#allocation3], 1 }
 0x104   :  { %295 = vsyncpa [#allocation3 + $0x1], 1 }

</bundles_post_ra>
